<compile_context>
chip_gen: v6e
topology: v6e:2x2x1
jax: 0.10.0
libtpu: 0.0.40
codegen_flags: <defaults>
</compile_context>

<pallas_src>
import math

import jax
import jax.numpy as jnp
from jax.experimental import pallas as pl
from jax.experimental.pallas import tpu as pltpu


# ---------------------------------------------------------------------------
# Fused kernel:  [conv(KxK) + ReLU] x n_layers  +  max/avg pool over H
# ---------------------------------------------------------------------------
def _make_fused_kernel(B, H0, layer_ks, h_final, pool_method):
    """Activations stay packed 2-D as (B*H0, W*C); row index = b*H0 + h for every layer."""
    n_rows = B * H0

    def kernel(*refs):
        # refs = (x, w_0, b_0, w_1, b_1, ..., out)
        x_ref, o_ref = refs[0], refs[-1]

        act = x_ref[...]                                   # (B*H0, n_in), f32
        for li, K in enumerate(layer_ks):
            w_ref = refs[1 + 2 * li]                       # (K, n_in_pad, n_out_pad) banded W
            b_ref = refs[2 + 2 * li]                       # (1, n_out_pad) tiled bias
            # acc[i] = sum_kh act[i+kh] @ W[kh]; M stays B*H0 -- junk tail rows per slab
            # (and the roll wrap-around rows) are computed but never read by the pool.
            acc = jnp.dot(act, w_ref[0], preferred_element_type=jnp.float32)
            for kh in range(1, K):
                # shifted[i] = act[(i + kh) % n_rows]  (XLU sublane rotate, full vregs)
                shifted = pltpu.roll(act, n_rows - kh, axis=0)
                acc = acc + jnp.dot(shifted, w_ref[kh],
                                    preferred_element_type=jnp.float32)
            act = jnp.maximum(acc + b_ref[...], 0.0)       # bias added once, then ReLU

        # Adaptive pool over H: reduce the h_final valid rows of each batch slab and emit a
        # single lane-dense (B, n_out_pad) store (no per-batch 1-row stores).
        n_last = act.shape[-1]
        row_ids = jax.lax.broadcasted_iota(jnp.int32, (B, n_last), 0)
        pooled = jnp.zeros((B, n_last), jnp.float32)
        for b in range(B):
            blk = act[b * H0: b * H0 + h_final, :]         # slab starts at b*H0 (8-aligned)
            if pool_method == "max":
                red = jnp.max(blk, axis=0, keepdims=True)
            else:  # 'avg'
                red = jnp.mean(blk, axis=0, keepdims=True)
            pooled = jnp.where(row_ids == b, jnp.broadcast_to(red, (B, n_last)), pooled)
        o_ref[...] = pooled

    return kernel


# ---------------------------------------------------------------------------
# Wrapper-side weight preparation (runs ONCE, outside the per-call path)
# ---------------------------------------------------------------------------
def _banded_weight(w, w_in):
    """Conv2d weight (Cout, Cin, K, K) -> per-kh banded matmul weight.

    big[kh, w_i*Cin + ci, w_o*Cout + co] = w[co, ci, kh, w_i - w_o] when 0 <= w_i - w_o < K
    else 0; shape (K, w_in*Cin, w_out*Cout).  A packed activation row (W*Cin lanes) times
    big[kh] yields the conv contribution of kernel row kh for all output cols/channels.
    """
    cout, cin, K, _ = w.shape
    w_out = w_in - K + 1
    wt = jnp.transpose(w, (2, 3, 1, 0))                                   # [kh, kw, ci, co]
    kw_idx = jnp.arange(w_in)[None, :] - jnp.arange(w_out)[:, None]       # (w_out, w_in)
    valid = (kw_idx >= 0) & (kw_idx < K)
    g = wt[:, jnp.clip(kw_idx, 0, K - 1)]                                 # (K, w_out, w_in, Cin, Cout)
    g = g * valid[None, :, :, None, None].astype(w.dtype)
    big = jnp.transpose(g, (0, 2, 3, 1, 4))                               # (K, w_in, Cin, w_out, Cout)
    return big.reshape(K, w_in * cin, w_out * cout)


def _round_up(n, m):
    return (n + m - 1) // m * m


def make_struct_convolution(params, input_shape, pool_method="max"):
    """Precompute banded/padded weights once and return a jitted forward(x) callable.

    params: list of (weight (Cout, Cin, K, K), bias (Cout,)) per conv layer.
    input_shape: (B, C0, H, W) torch convention.
    """
    assert pool_method in ("max", "avg")
    B, c0, H, W = input_shape

    layer_ks, wb = [], []
    flops = 0
    h_cur, w_cur, c_cur = H, W, c0
    n_in = W * c0                                   # contraction width the next dot will see
    for (w, b) in params:
        cout, cin, K, K2 = w.shape
        assert K == K2 and cin == c_cur
        w_out = w_cur - K + 1
        n_out = w_out * cout
        n_out_pad = _round_up(n_out, 128)           # full lane groups: 112->128, 192->256

        big = _banded_weight(w, w_cur)                                      # (K, w_cur*cin, n_out)
        big = jnp.pad(big, ((0, 0), (0, n_in - w_cur * cin), (0, n_out_pad - n_out)))
        bias = jnp.pad(jnp.tile(b, (w_out,)), (0, n_out_pad - n_out)).reshape(1, n_out_pad)
        wb += [big, bias]
        layer_ks.append(K)
        flops += 2 * (B * H) * n_in * n_out_pad * K

        h_cur, w_cur, c_cur = h_cur - (K - 1), w_out, cout
        n_in = n_out_pad

    # Loose-rows safety: every layer must leave >= 1 valid output row per batch slab so the
    # junk (cross-batch / wrap-around) rows are never read by the pool.
    assert h_cur >= 1, "filter stack consumes the whole height; loose-rows packing is unsafe"

    n_valid = w_cur * c_cur                          # 192
    n_pad_last = n_in                                # 256
    wb = [jnp.asarray(a, jnp.float32) for a in wb]   # concrete, prepared once

    bytes_accessed = (B * H * W * c0 + sum(int(a.size) for a in wb) + B * n_pad_last) * 4

    kernel = _make_fused_kernel(B, H, layer_ks, h_cur, pool_method)
    vmem = pl.BlockSpec(memory_space=pltpu.MemorySpace.VMEM)
    call = pl.pallas_call(
        kernel,
        out_shape=jax.ShapeDtypeStruct((B, n_pad_last), jnp.float32),
        in_specs=[vmem] * (1 + len(wb)),
        out_specs=vmem,
        cost_estimate=pl.CostEstimate(flops=int(flops), transcendentals=0,
                                      bytes_accessed=int(bytes_accessed)),
    )

    @jax.jit
    def fwd(x_nchw, wb_flat):
        # NCHW -> NHWC -> (B*H, W*C0): the lane axis carries W*C (lane-dense packing).
        x_packed = jnp.transpose(x_nchw, (0, 2, 3, 1)).reshape(B * H, W * c0)
        out_packed = call(x_packed, *wb_flat)                        # (B, n_pad_last)
        out = out_packed[:, :n_valid].reshape(B, w_cur, c_cur).transpose(0, 2, 1)
        return jnp.squeeze(out)                                       # torch .squeeze()

    return lambda x: fwd(x, wb)


# ---------------------------------------------------------------------------
# Parameter init (matches nn.init.xavier_uniform_ + constant bias 0.1)
# ---------------------------------------------------------------------------
def init_params(key, channels_list, filter_sizes):
    params = []
    for i, K in enumerate(filter_sizes):
        cin, cout = channels_list[i], channels_list[i + 1]
        bound = math.sqrt(6.0 / (cin * K * K + cout * K * K))
        key, sub = jax.random.split(key)
        w = jax.random.uniform(sub, (cout, cin, K, K), jnp.float32, -bound, bound)
        b = jnp.full((cout,), 0.1, jnp.float32)
        params.append((w, b))
    return params


# ---------------------------------------------------------------------------
# Pure-JAX reference (for correctness check only)
# ---------------------------------------------------------------------------
def _reference(x_nchw, params, pool_method="max"):
    out = x_nchw
    for (w, b) in params:
        out = jax.lax.conv_general_dilated(
            out, w, window_strides=(1, 1), padding="VALID",
            dimension_numbers=("NCHW", "OIHW", "NCHW"),
            precision=jax.lax.Precision.HIGHEST)
        out = jax.nn.relu(out + b[None, :, None, None])
    out = jnp.max(out, axis=2) if pool_method == "max" else jnp.mean(out, axis=2)
    return jnp.squeeze(out)


if __name__ == "__main__":
    channels_list = [4, 8, 16]
    filter_sizes = [3, 3]

    key = jax.random.PRNGKey(0)
    kx, kp = jax.random.split(key)

    # torch-style NCHW input: batch=2, channels=4, spatial=16x16
    x = jax.random.normal(kx, (2, 4, 16, 16), jnp.float32)
    params = init_params(kp, channels_list, filter_sizes)

    # Banded weights are prepared ONCE here; fwd(x) only packs x and launches the kernel.
    fwd = make_struct_convolution(params, x.shape, pool_method="max")
    out = jax.block_until_ready(fwd(x))

    # conv(3x3) twice: 16 -> 14 -> 12 spatial, pool H to 1, squeeze -> (B, C_out, W_out)
    assert out.shape == (2, 16, 12), out.shape
    assert bool(jnp.all(out >= 0.0))  # ReLU + max-pool output is non-negative

    ref = _reference(x, params)
    max_err = float(jnp.max(jnp.abs(out - ref)))
    assert jnp.allclose(out, ref, rtol=2e-2, atol=2e-2), max_err

    print("KERNEL_OK")
</pallas_src>

<mosaic_0001>
module attributes {stable_mosaic.version = 11 : i64} {
  func.func @kernel(%arg0: memref<32x64xf32, #tpu.memory_space<vmem>>, %arg1: memref<3x64x128xf32, #tpu.memory_space<vmem>>, %arg2: memref<1x128xf32, #tpu.memory_space<vmem>>, %arg3: memref<3x128x256xf32, #tpu.memory_space<vmem>>, %arg4: memref<1x256xf32, #tpu.memory_space<vmem>>, %arg5: memref<2x256xf32, #tpu.memory_space<vmem>>) attributes {dimension_semantics = [], scalar_prefetch = 0 : i64, scratch_operands = 0 : i64, tpu.core_type = #tpu.core_type<tc>} {
    %c0 = arith.constant 0 : index
    %c0_0 = arith.constant 0 : index
    %0 = vector.load %arg0[%c0, %c0_0] : memref<32x64xf32, #tpu.memory_space<vmem>>, vector<32x64xf32>
    %c0_1 = arith.constant 0 : index
    %c0_2 = arith.constant 0 : index
    %c0_3 = arith.constant 0 : index
    %1 = vector.load %arg1[%c0_1, %c0_2, %c0_3] : memref<3x64x128xf32, #tpu.memory_space<vmem>>, vector<1x64x128xf32>
    %2 = vector.shape_cast %1 : vector<1x64x128xf32> to vector<64x128xf32>
    %cst = arith.constant dense<0.000000e+00> : vector<32x128xf32>
    %3 = tpu.matmul %0, %2, %cst {dimension_numbers = #tpu.dot_dimension_numbers<[1], [0], [0], [1], [0, 0, 1, 1], [], []>} : vector<32x64xf32>, vector<64x128xf32>, vector<32x128xf32> -> vector<32x128xf32>
    %c31_i32 = arith.constant 31 : i32
    %4 = tpu.dynamic_rotate %0 by %c31_i32 dim 0 : vector<32x64xf32>, i32 -> vector<32x64xf32>
    %c1 = arith.constant 1 : index
    %c0_4 = arith.constant 0 : index
    %c0_5 = arith.constant 0 : index
    %5 = vector.load %arg1[%c1, %c0_4, %c0_5] : memref<3x64x128xf32, #tpu.memory_space<vmem>>, vector<1x64x128xf32>
    %6 = vector.shape_cast %5 : vector<1x64x128xf32> to vector<64x128xf32>
    %cst_6 = arith.constant dense<0.000000e+00> : vector<32x128xf32>
    %7 = tpu.matmul %4, %6, %cst_6 {dimension_numbers = #tpu.dot_dimension_numbers<[1], [0], [0], [1], [0, 0, 1, 1], [], []>} : vector<32x64xf32>, vector<64x128xf32>, vector<32x128xf32> -> vector<32x128xf32>
    %8 = arith.addf %3, %7 : vector<32x128xf32>
    %c30_i32 = arith.constant 30 : i32
    %9 = tpu.dynamic_rotate %0 by %c30_i32 dim 0 : vector<32x64xf32>, i32 -> vector<32x64xf32>
    %c2 = arith.constant 2 : index
    %c0_7 = arith.constant 0 : index
    %c0_8 = arith.constant 0 : index
    %10 = vector.load %arg1[%c2, %c0_7, %c0_8] : memref<3x64x128xf32, #tpu.memory_space<vmem>>, vector<1x64x128xf32>
    %11 = vector.shape_cast %10 : vector<1x64x128xf32> to vector<64x128xf32>
    %cst_9 = arith.constant dense<0.000000e+00> : vector<32x128xf32>
    %12 = tpu.matmul %9, %11, %cst_9 {dimension_numbers = #tpu.dot_dimension_numbers<[1], [0], [0], [1], [0, 0, 1, 1], [], []>} : vector<32x64xf32>, vector<64x128xf32>, vector<32x128xf32> -> vector<32x128xf32>
    %13 = arith.addf %8, %12 : vector<32x128xf32>
    %c0_10 = arith.constant 0 : index
    %c0_11 = arith.constant 0 : index
    %14 = vector.load %arg2[%c0_10, %c0_11] : memref<1x128xf32, #tpu.memory_space<vmem>>, vector<1x128xf32>
    %15 = vector.broadcast %14 : vector<1x128xf32> to vector<32x128xf32>
    %16 = arith.addf %13, %15 : vector<32x128xf32>
    %cst_12 = arith.constant 0.000000e+00 : f32
    %17 = vector.broadcast %cst_12 : f32 to vector<32x128xf32>
    %18 = arith.maximumf %16, %17 : vector<32x128xf32>
    %c0_13 = arith.constant 0 : index
    %c0_14 = arith.constant 0 : index
    %c0_15 = arith.constant 0 : index
    %19 = vector.load %arg3[%c0_13, %c0_14, %c0_15] : memref<3x128x256xf32, #tpu.memory_space<vmem>>, vector<1x128x256xf32>
    %20 = vector.shape_cast %19 : vector<1x128x256xf32> to vector<128x256xf32>
    %cst_16 = arith.constant dense<0.000000e+00> : vector<32x256xf32>
    %21 = tpu.matmul %18, %20, %cst_16 {dimension_numbers = #tpu.dot_dimension_numbers<[1], [0], [0], [1], [0, 0, 1, 1], [], []>} : vector<32x128xf32>, vector<128x256xf32>, vector<32x256xf32> -> vector<32x256xf32>
    %c31_i32_17 = arith.constant 31 : i32
    %22 = tpu.dynamic_rotate %18 by %c31_i32_17 dim 0 : vector<32x128xf32>, i32 -> vector<32x128xf32>
    %c1_18 = arith.constant 1 : index
    %c0_19 = arith.constant 0 : index
    %c0_20 = arith.constant 0 : index
    %23 = vector.load %arg3[%c1_18, %c0_19, %c0_20] : memref<3x128x256xf32, #tpu.memory_space<vmem>>, vector<1x128x256xf32>
    %24 = vector.shape_cast %23 : vector<1x128x256xf32> to vector<128x256xf32>
    %cst_21 = arith.constant dense<0.000000e+00> : vector<32x256xf32>
    %25 = tpu.matmul %22, %24, %cst_21 {dimension_numbers = #tpu.dot_dimension_numbers<[1], [0], [0], [1], [0, 0, 1, 1], [], []>} : vector<32x128xf32>, vector<128x256xf32>, vector<32x256xf32> -> vector<32x256xf32>
    %26 = arith.addf %21, %25 : vector<32x256xf32>
    %c30_i32_22 = arith.constant 30 : i32
    %27 = tpu.dynamic_rotate %18 by %c30_i32_22 dim 0 : vector<32x128xf32>, i32 -> vector<32x128xf32>
    %c2_23 = arith.constant 2 : index
    %c0_24 = arith.constant 0 : index
    %c0_25 = arith.constant 0 : index
    %28 = vector.load %arg3[%c2_23, %c0_24, %c0_25] : memref<3x128x256xf32, #tpu.memory_space<vmem>>, vector<1x128x256xf32>
    %29 = vector.shape_cast %28 : vector<1x128x256xf32> to vector<128x256xf32>
    %cst_26 = arith.constant dense<0.000000e+00> : vector<32x256xf32>
    %30 = tpu.matmul %27, %29, %cst_26 {dimension_numbers = #tpu.dot_dimension_numbers<[1], [0], [0], [1], [0, 0, 1, 1], [], []>} : vector<32x128xf32>, vector<128x256xf32>, vector<32x256xf32> -> vector<32x256xf32>
    %31 = arith.addf %26, %30 : vector<32x256xf32>
    %c0_27 = arith.constant 0 : index
    %c0_28 = arith.constant 0 : index
    %32 = vector.load %arg4[%c0_27, %c0_28] : memref<1x256xf32, #tpu.memory_space<vmem>>, vector<1x256xf32>
    %33 = vector.broadcast %32 : vector<1x256xf32> to vector<32x256xf32>
    %34 = arith.addf %31, %33 : vector<32x256xf32>
    %cst_29 = arith.constant 0.000000e+00 : f32
    %35 = vector.broadcast %cst_29 : f32 to vector<32x256xf32>
    %36 = arith.maximumf %34, %35 : vector<32x256xf32>
    %37 = tpu.iota {dimensions = array<i32: 0>} : vector<2x256xi32>
    %cst_30 = arith.constant 0.000000e+00 : f32
    %38 = vector.broadcast %cst_30 : f32 to vector<2x256xf32>
    %39 = vector.extract_strided_slice %36 {offsets = [0, 0], sizes = [12, 256], strides = [1, 1]} : vector<32x256xf32> to vector<12x256xf32>
    %cst_31 = arith.constant dense<0xFF800000> : vector<256xf32>
    %40 = vector.multi_reduction <maximumf>, %39, %cst_31 [0] : vector<12x256xf32> to vector<256xf32>
    %41 = vector.shape_cast %40 : vector<256xf32> to vector<1x256xf32>
    %c0_i32 = arith.constant 0 : i32
    %42 = vector.broadcast %c0_i32 : i32 to vector<2x256xi32>
    %43 = arith.cmpi eq, %37, %42 : vector<2x256xi32>
    %44 = vector.shape_cast %41 : vector<1x256xf32> to vector<1x256xf32>
    %45 = vector.broadcast %44 : vector<1x256xf32> to vector<2x256xf32>
    %46 = arith.select %43, %45, %38 : vector<2x256xi1>, vector<2x256xf32>
    %47 = vector.extract_strided_slice %36 {offsets = [16, 0], sizes = [12, 256], strides = [1, 1]} : vector<32x256xf32> to vector<12x256xf32>
    %cst_32 = arith.constant dense<0xFF800000> : vector<256xf32>
    %48 = vector.multi_reduction <maximumf>, %47, %cst_32 [0] : vector<12x256xf32> to vector<256xf32>
    %49 = vector.shape_cast %48 : vector<256xf32> to vector<1x256xf32>
    %c1_i32 = arith.constant 1 : i32
    %50 = vector.broadcast %c1_i32 : i32 to vector<2x256xi32>
    %51 = arith.cmpi eq, %37, %50 : vector<2x256xi32>
    %52 = vector.shape_cast %49 : vector<1x256xf32> to vector<1x256xf32>
    %53 = vector.broadcast %52 : vector<1x256xf32> to vector<2x256xf32>
    %54 = arith.select %51, %53, %46 : vector<2x256xi1>, vector<2x256xf32>
    %c0_33 = arith.constant 0 : index
    %c0_34 = arith.constant 0 : index
    %55 = vector.load %arg5[%c0_33, %c0_34] : memref<2x256xf32, #tpu.memory_space<vmem>>, vector<2x256xf32>
    tpu.vector_store %arg5[%c0_33, %c0_34], %54 {strides = array<i32>} : memref<2x256xf32, #tpu.memory_space<vmem>>, vector<2x256xf32>,
    return
  }
}

</mosaic_0001>

<bundles_post_ra>
// kernel: fwd.1
= control target key start
LH: loop header
LB: loop body
LE: loop exit
PB: predicated region body
PF: predicated region fallthrough
CT: control target
= control target key end

     0   :  { %10 = vsyncpa [#allocation3], 0  ;;  %s1026_s18 = smov [#allocation2]   ;;  %s1264_s0 = inlined_call_operand.vmem [shape: f32[32,64], index: 0, kind: input, shape index: {}]   ;;  %s1265_s1 = inlined_call_operand.vmem [shape: f32[3,64,128], index: 1, kind: input, shape index: {}]   ;;  %s1266_s2 = inlined_call_operand.vmem [shape: f32[1,128], index: 2, kind: input, shape index: {}]   ;;  %s1267_s3 = inlined_call_operand.hbm [shape: f32[3,128,256], index: 3, kind: input, shape index: {}]   ;;  %s1268_s4 = inlined_call_operand.vmem [shape: f32[1,256], index: 4, kind: input, shape index: {}]   ;;  %s1269_s5 = inlined_call_operand.vmem [shape: f32[2,256], index: 5, kind: output, shape index: {}]  }
   0x1   :  { %s22_s19 = sshll.u32 %s1026_s18, 4  ;;  %s23_s19 = int_to_ptr.vmem [resolvable:$true] %s22_s19 }
   0x2   :  { %s1012_s20 = scalar_lea.vmem %s23_s19, 12288  ;;  %p1017_p1 = scmp.lt.s32.totalorder %s23_s19, %s23_s19 }
   0x3   :  { %p1013_p0 = scmp.ne.s32.totalorder %s23_s19, %s1012_s20  ;;  %p1018_p2 = scmp.lt.s32.totalorder %s1012_s20, %s1012_s20 }
   0x5   :  { %p1019_p3 = por %p1018_p2, %p1017_p1 }
   0x7   :  { %p1020_p4 = pnand %p1019_p3, %p1013_p0 }
   0x9   :  { %1023 = shalt.err (!%p1020_p4)
}
   0xa   :  { %s1027_s21 = smov 256   ;;  %s1028_s22 = smov 16  }
   0xb   :  { %28 = dma.hbm_to_vmem [thread:$0]  %s1267_s3, 12288, %s23_s19, [#allocation3], %s1027_s21, %s1027_s21, %s1028_s22  }
   0xc   :  { %1024 = dma.done.wait [#allocation3], 12288  }
   0xd   :  { %1025 = vsyncadd [#allocation3], 4294955008  ;;  %v875_v0 = vld [vmem:[%s1265_s1 + $0x78] sm:$0xff]  ;;  %v874_v2 = vld [vmem:[%s1265_s1 + $0x70] sm:$0xff]  ;;  %v50_v6 = vlaneseq  ;;  %vm66_vm1 = vcmask 523264   ;;  %vm812_vm3 = vcmask 1043456  }
   0xe   :  { %v45_v1 = vld [vmem:[%s1265_s1 + $0x38] sm:$0xff]  ;;  %934 = vmatprep.subr.mxu0 %v875_v0  ;;  %v44_v3 = vld [vmem:[%s1265_s1 + $0x30] sm:$0xff]  ;;  %v873_v4 = vld [vmem:[%s1265_s1 + $0x68] sm:$0xff] }
   0xf   :  { %956 = vmatprep.subr.mxu1 %v45_v1  ;;  %935 = vmatpush3.msra.mxu0 %v875_v0  ;;  %v43_v5 = vld [vmem:[%s1265_s1 + $0x28] sm:$0xff]  ;;  %v872_v7 = vld [vmem:[%s1265_s1 + $0x60] sm:$0xff]  ;;  %v871_v9 = vld [vmem:[%s1265_s1 + $0x58] sm:$0xff]  ;;  %v1103_v13 = vshrl.u32 %v50_v6, 7 }
  0x10   :  { %957 = vmatpush3.msra.mxu1 %v45_v1  ;;  %936 = vmatprep.subr.mxu0 %v874_v2  ;;  %v42_v8 = vld [vmem:[%s1265_s1 + $0x20] sm:$0xff]  ;;  %v41_v10 = vld [vmem:[%s1265_s1 + $0x18] sm:$0xff]  ;;  %v1101_v12 = vld [vmem:[%s1264_s0 + $0x8] sm:$0xff] }
  0x11   :  { %958 = vmatprep.subr.mxu1 %v44_v3  ;;  %937 = vmatpush3.msra.mxu0 %v874_v2  ;;  %v1096_v11 = vld [vmem:[%s1264_s0] sm:$0xff]  ;;  %v870_v14 = vld [vmem:[%s1265_s1 + $0x50] sm:$0xff]  ;;  %v47_v18 = vrot.slane %v1101_v12, 1  ;;  %v1121_v19 = vld [vmem:[%s1264_s0 + $0x18] sm:$0xff]  ;;  %vm52_vm0 = vcmp.lt.s32.totalorder %v1103_v13, 7  ;;  %v262_v31 = vrot.slane %v1101_v12, 2 }
  0x12   :  { %959 = vmatpush3.msra.mxu1 %v44_v3  ;;  %938 = vmatprep.subr.mxu0 %v873_v4  ;;  %v40_v15 = vld [vmem:[%s1265_s1 + $0x10] sm:$0xff]  ;;  %v46_v17 = vrot.slane %v1096_v11, 1  ;;  %v869_v20 = vld [vmem:[%s1265_s1 + $0x48] sm:$0xff]  ;;  %v868_v23 = vld [vmem:[%s1265_s1 + $0x40] sm:$0xff]  ;;  %v49_v25 = vrot.slane %v1121_v19, 1  ;;  %v261_v30 = vrot.slane %v1096_v11, 2 }
  0x13   :  { %960 = vmatprep.subr.mxu1 %v43_v5  ;;  %939 = vmatpush3.msra.mxu0 %v873_v4  ;;  %v1114_v16 = vld [vmem:[%s1264_s0 + $0x10] sm:$0xff]  ;;  %v39_v21 = vld [vmem:[%s1265_s1 + $0x8] sm:$0xff]  ;;  %v38_v24 = vld [vmem:[%s1265_s1] sm:$0xff]  ;;  %vm265_vm2 = vcmp.lt.s32.totalorder %v1103_v13, 6  ;;  %v264_v46 = vrot.slane %v1121_v19, 2  ;;  %vm829_vm4 = vcmp.eq.s32.totalorder %v1103_v13, 0 }
  0x14   :  { %961 = vmatpush3.msra.mxu1 %v43_v5  ;;  %940 = vmatprep.subr.mxu0 %v872_v7  ;;  %v48_v22 = vrot.slane %v1114_v16, 1  ;;  %v55_v26 = vsel %vm52_vm0, %v46_v17, %v47_v18  ;;  %v891_v28 = vld [vmem:[%s1265_s1 + $0xb8] sm:$0xff]  ;;  %v890_v32 = vld [vmem:[%s1265_s1 + $0xb0] sm:$0xff]  ;;  %v889_v34 = vld [vmem:[%s1265_s1 + $0xa8] sm:$0xff]  ;;  %v56_v35 = vsel %vm52_vm0, %v49_v25, %v46_v17  ;;  %v268_v36 = vsel %vm265_vm2, %v261_v30, %v262_v31 }
  0x15   :  { %962 = vmatprep.subr.mxu1 %v42_v8  ;;  %941 = vmatpush3.msra.mxu0 %v872_v7  ;;  %v467_v33 = vld [vmem:[#allocation2 + $0x1f8] sm:$0xff]  ;;  %v888_v37 = vld [vmem:[%s1265_s1 + $0xa0] sm:$0xff]  ;;  %v466_v38 = vld [vmem:[#allocation2 + $0x1f0] sm:$0xff]  ;;  %v263_v44 = vrot.slane %v1114_v16, 2  ;;  %v269_v54 = vsel %vm265_vm2, %v264_v46, %v261_v30  ;;  %vm848_vm5 = vcmp.eq.s32.totalorder %v1103_v13, 1 }
  0x16   :  { %963 = vmatpush3.msra.mxu1 %v42_v8  ;;  %942 = vmatprep.subr.mxu0 %v871_v9  ;;  %v54_v27 = vsel %vm52_vm0, %v47_v18, %v48_v22  ;;  %v53_v29 = vsel %vm52_vm0, %v48_v22, %v49_v25  ;;  %v465_v39 = vld [vmem:[#allocation2 + $0x1e8] sm:$0xff]  ;;  %v887_v40 = vld [vmem:[%s1265_s1 + $0x98] sm:$0xff]  ;;  %v464_v41 = vld [vmem:[#allocation2 + $0x1e0] sm:$0xff] }
  0x17   :  { %964 = vmatprep.subr.mxu1 %v41_v10  ;;  %943 = vmatpush3.msra.mxu0 %v871_v9  ;;  %v463_v42 = vld [vmem:[#allocation2 + $0x1d8] sm:$0xff]  ;;  %v886_v43 = vld [vmem:[%s1265_s1 + $0x90] sm:$0xff]  ;;  %v885_v45 = vld [vmem:[%s1265_s1 + $0x88] sm:$0xff]  ;;  %v267_v48 = vsel %vm265_vm2, %v262_v31, %v263_v44  ;;  %v266_v50 = vsel %vm265_vm2, %v263_v44, %v264_v46  ;;  %v1029_v46 = vmov 0.0  }
  0x18   :  { %965 = vmatpush3.msra.mxu1 %v41_v10  ;;  %944 = vmatprep.subr.mxu0 %v870_v14  ;;  %v884_v47 = vld [vmem:[%s1265_s1 + $0x80] sm:$0xff]  ;;  %v426_v49 = vld [vmem:[#allocation2 + $0xf8] sm:$0xff]  ;;  %v425_v51 = vld [vmem:[#allocation2 + $0xf0] sm:$0xff] }
  0x19   :  { %966 = vmatprep.subr.mxu1 %v40_v15  ;;  %945 = vmatpush3.msra.mxu0 %v870_v14  ;;  %v424_v52 = vld [vmem:[#allocation2 + $0xe8] sm:$0xff]  ;;  %v423_v53 = vld [vmem:[#allocation2 + $0xe0] sm:$0xff]  ;;  %v422_v55 = vld [vmem:[#allocation2 + $0xd8] sm:$0xff] }
  0x1a   :  { %967 = vmatpush3.msra.mxu1 %v40_v15  ;;  %946 = vmatprep.subr.mxu0 %v869_v20  ;;  %v421_v56 = vld [vmem:[#allocation2 + $0xd0] sm:$0xff]  ;;  %v420_v57 = vld [vmem:[#allocation2 + $0xc8] sm:$0xff]  ;;  %v419_v59 = vld [vmem:[#allocation2 + $0xc0] sm:$0xff] }
  0x1b   :  { %968 = vmatprep.subr.mxu1 %v39_v21  ;;  %947 = vmatpush3.msra.mxu0 %v869_v20  ;;  %v462_v58 = vld [vmem:[#allocation2 + $0x1d0] sm:$0xff]  ;;  %v461_v60 = vld [vmem:[#allocation2 + $0x1c8] sm:$0xff]  ;;  %v418_v61 = vld [vmem:[#allocation2 + $0xb8] sm:$0xff] }
  0x1c   :  { %969 = vmatpush3.msra.mxu1 %v39_v21  ;;  %948 = vmatprep.subr.mxu0 %v868_v23  ;;  %v460_v62 = vld [vmem:[#allocation2 + $0x1c0] sm:$0xff]  ;;  %v417_v63 = vld [vmem:[#allocation2 + $0xb0] sm:$0xff]  ;;  %v459_v0 = vld [vmem:[#allocation2 + $0x1b8] sm:$0xff] }
  0x1d   :  { %970 = vmatprep.subr.mxu1 %v38_v24  ;;  %949 = vmatpush3.msra.mxu0 %v868_v23  ;;  %v416_v1 = vld [vmem:[#allocation2 + $0xa8] sm:$0xff]  ;;  %v458_v2 = vld [vmem:[#allocation2 + $0x1b0] sm:$0xff]  ;;  %v415_v3 = vld [vmem:[#allocation2 + $0xa0] sm:$0xff] }
  0x1e   :  { %950 = vmatprep.mubr.msk.f32.mxu0 %vm66_vm1, %v55_v26  ;;  %971 = vmatpush3.msra.mxu1 %v38_v24  ;;  %v457_v4 = vld [vmem:[#allocation2 + $0x1a8] sm:$0xff]  ;;  %v414_v5 = vld [vmem:[#allocation2 + $0x98] sm:$0xff]  ;;  %v456_v6 = vld [vmem:[#allocation2 + $0x1a0] sm:$0xff] }
  0x1f   :  { %972 = vmatprep.mubr.msk.f32.mxu1 %vm66_vm1, %v1096_v11  ;;  %951 = vmatmul.mubr.msk.f32.vlgmr.msra.gmra.mxu0 %vm66_vm1, %v54_v27  ;;  %v413_v7 = vld [vmem:[#allocation2 + $0x90] sm:$0xff]  ;;  %v455_v8 = vld [vmem:[#allocation2 + $0x198] sm:$0xff]  ;;  %v412_v9 = vld [vmem:[#allocation2 + $0x88] sm:$0xff] }
  0x20   :  { %973 = vmatmul.mubr.msk.f32.vlgmr.msra.gmra.mxu1 %vm66_vm1, %v1101_v12  ;;  %978 = vmatprep.subr.mxu0 %v891_v28  ;;  %v454_v10 = vld [vmem:[#allocation2 + $0x190] sm:$0xff]  ;;  %v411_v11 = vld [vmem:[#allocation2 + $0x80] sm:$0xff]  ;;  %v453_v12 = vld [vmem:[#allocation2 + $0x188] sm:$0xff] }
  0x21   :  { %953 = vmatprep.mubr.msk.f32.mxu0 %vm66_vm1, %v53_v29  ;;  %979 = vmatpush3.msra.mxu0 %v891_v28  ;;  %v410_v14 = vld [vmem:[#allocation2 + $0x78] sm:$0xff]  ;;  %v452_v15 = vld [vmem:[#allocation2 + $0x180] sm:$0xff]  ;;  %v408_v18 = vld [vmem:[#allocation2 + $0x68] sm:$0xff] }
  0x22   :  { %975 = vmatprep.mubr.msk.f32.mxu1 %vm66_vm1, %v1114_v16  ;;  %980 = vmatprep.subr.mxu0 %v890_v32  ;;  %v409_v16 = vld [vmem:[#allocation2 + $0x70] sm:$0xff]  ;;  %v451_v17 = vld [vmem:[#allocation2 + $0x178] sm:$0xff]  ;;  %v407_v20 = vld [vmem:[#allocation2 + $0x60] sm:$0xff] }
  0x23   :  { %468 = vmatprep.subr.mxu1 %v467_v33  ;;  %981 = vmatpush3.msra.mxu0 %v890_v32  ;;  %v449_v21 = vld [vmem:[#allocation2 + $0x168] sm:$0xff]  ;;  %v406_v22 = vld [vmem:[#allocation2 + $0x58] sm:$0xff]  ;;  %v448_v23 = vld [vmem:[#allocation2 + $0x160] sm:$0xff] }
  0x24   :  { %976 = vmatmul.mubr.msk.f32.gmra.mxu1 %vm66_vm1, %v1121_v19  ;;  %982 = vmatprep.subr.mxu0 %v889_v34  ;;  %v450_v19 = vld [vmem:[#allocation2 + $0x170] sm:$0xff]  ;;  %v447_v25 = vld [vmem:[#allocation2 + $0x158] sm:$0xff]  ;;  %v404_v26 = vld [vmem:[#allocation2 + $0x48] sm:$0xff] }
  0x25   :  { %954 = vmatmul.mubr.msk.f32.gmra.mxu0 %vm66_vm1, %v56_v35  ;;  %469 = vmatpush1.msra.mxu1 %v466_v38  ;;  %v405_v24 = vld [vmem:[#allocation2 + $0x50] sm:$0xff]  ;;  %v403_v28 = vld [vmem:[#allocation2 + $0x40] sm:$0xff]  ;;  %v445_v29 = vld [vmem:[#allocation2 + $0x148] sm:$0xff] }
  0x26   :  { %983 = vmatpush3.msra.mxu0 %v889_v34  ;;  %994 = vmatprep.mubr.msk.f32.mxu0 %vm66_vm1, %v268_v36  ;;  %v446_v27 = vld [vmem:[#allocation2 + $0x150] sm:$0xff]  ;;  %v402_v30 = vld [vmem:[#allocation2 + $0x38] sm:$0xff]  ;;  %v444_v31 = vld [vmem:[#allocation2 + $0x140] sm:$0xff] }
  0x27   :  { %984 = vmatprep.subr.mxu0 %v888_v37  ;;  %470 = vmatprep.subr.mxu1 %v465_v39  ;;  %v401_v32 = vld [vmem:[#allocation2 + $0x30] sm:$0xff]  ;;  %v443_v33 = vld [vmem:[#allocation2 + $0x138] sm:$0xff]  ;;  %v400_v34 = vld [vmem:[#allocation2 + $0x28] sm:$0xff] }
  0x28   :  { %985 = vmatpush3.msra.mxu0 %v888_v37  ;;  %471 = vmatpush1.msra.mxu1 %v464_v41  ;;  %v442_v35 = vld [vmem:[#allocation2 + $0x130] sm:$0xff]  ;;  %v399_v36 = vld [vmem:[#allocation2 + $0x20] sm:$0xff]  ;;  %v441_v37 = vld [vmem:[#allocation2 + $0x128] sm:$0xff] }
  0x29   :  { %986 = vmatprep.subr.mxu0 %v887_v40  ;;  %472 = vmatprep.subr.mxu1 %v463_v42  ;;  %v398_v38 = vld [vmem:[#allocation2 + $0x18] sm:$0xff]  ;;  %v440_v39 = vld [vmem:[#allocation2 + $0x120] sm:$0xff]  ;;  %v396_v42 = vld [vmem:[#allocation2 + $0x8] sm:$0xff] }
  0x2a   :  { %987 = vmatpush3.msra.mxu0 %v887_v40  ;;  %473 = vmatpush1.msra.mxu1 %v462_v58  ;;  %v397_v40 = vld [vmem:[#allocation2 + $0x10] sm:$0xff]  ;;  %v439_v41 = vld [vmem:[#allocation2 + $0x118] sm:$0xff]  ;;  %v395_v44 = vld [vmem:[#allocation2] sm:$0xff] }
  0x2b   :  { %988 = vmatprep.subr.mxu0 %v886_v43  ;;  %474 = vmatprep.subr.mxu1 %v461_v60  ;;  %v896_v58 = vld [vmem:[%s1266_s2] ss:$0 sm:$0xff] }
  0x2c   :  { %989 = vmatpush3.msra.mxu0 %v886_v43  ;;  %475 = vmatpush1.msra.mxu1 %v460_v62  ;;  %v438_v43 = vld [vmem:[#allocation2 + $0x110] sm:$0xff] }
  0x2d   :  { %990 = vmatprep.subr.mxu0 %v885_v45  ;;  %476 = vmatprep.subr.mxu1 %v459_v0 }
  0x2e   :  { %991 = vmatpush3.msra.mxu0 %v885_v45  ;;  %477 = vmatpush1.msra.mxu1 %v458_v2  ;;  %v437_v45 = vld [vmem:[#allocation2 + $0x108] sm:$0xff] }
  0x2f   :  { %992 = vmatprep.subr.mxu0 %v884_v47  ;;  %478 = vmatprep.subr.mxu1 %v457_v4 }
  0x30   :  { %993 = vmatpush3.msra.mxu0 %v884_v47  ;;  %479 = vmatpush1.msra.mxu1 %v456_v6  ;;  %v436_v47 = vld [vmem:[#allocation2 + $0x100] sm:$0xff] }
  0x31   :  { %995 = vmatmul.mubr.msk.f32.vlgmr.msra.gmra.mxu0 %vm66_vm1, %v267_v48  ;;  %557 = vmatprep.subr.mxu0 %v426_v49  ;;  %v686_v48 = vld [vmem:[#allocation2 + $0x2f8] sm:$0xff] }
  0x32   :  { %997 = vmatprep.mubr.msk.f32.mxu0 %vm66_vm1, %v266_v50  ;;  %558 = vmatpush1.msra.mxu0 %v425_v51 }
  0x33   :  { %559 = vmatprep.subr.mxu0 %v424_v52  ;;  %480 = vmatprep.subr.mxu1 %v455_v8 }
  0x34   :  { %560 = vmatpush1.msra.mxu0 %v423_v53  ;;  %481 = vmatpush1.msra.mxu1 %v454_v10 }
  0x35   :  { %998 = vmatmul.mubr.msk.f32.gmra.mxu0 %vm66_vm1, %v269_v54  ;;  %561 = vmatprep.subr.mxu0 %v422_v55 }
  0x36   :  { %562 = vmatpush1.msra.mxu0 %v421_v56  ;;  %482 = vmatprep.subr.mxu1 %v453_v12 }
  0x37   :  { %563 = vmatprep.subr.mxu0 %v420_v57  ;;  %483 = vmatpush1.msra.mxu1 %v452_v15  ;;  %v685_v15 = vld [vmem:[#allocation2 + $0x2f0] sm:$0xff] }
  0x38   :  { %564 = vmatpush1.msra.mxu0 %v419_v59  ;;  %484 = vmatprep.subr.mxu1 %v451_v17  ;;  %v684_v17 = vld [vmem:[#allocation2 + $0x2e8] sm:$0xff] }
  0x39   :  { %565 = vmatprep.subr.mxu0 %v418_v61  ;;  %485 = vmatpush1.msra.mxu1 %v450_v19  ;;  %v683_v19 = vld [vmem:[#allocation2 + $0x2e0] sm:$0xff] }
  0x3a   :  { %566 = vmatpush1.msra.mxu0 %v417_v63  ;;  %486 = vmatprep.subr.mxu1 %v449_v21 }
  0x3b   :  { %567 = vmatprep.subr.mxu0 %v416_v1  ;;  %487 = vmatpush1.msra.mxu1 %v448_v23  ;;  %v681_v23 = vld [vmem:[#allocation2 + $0x2d0] sm:$0xff] }
  0x3c   :  { %568 = vmatpush1.msra.mxu0 %v415_v3  ;;  %488 = vmatprep.subr.mxu1 %v447_v25  ;;  %v680_v25 = vld [vmem:[#allocation2 + $0x2c8] sm:$0xff] }
  0x3d   :  { %569 = vmatprep.subr.mxu0 %v414_v5  ;;  %489 = vmatpush1.msra.mxu1 %v446_v27  ;;  %v678_v27 = vld [vmem:[#allocation2 + $0x2b8] sm:$0xff] }
  0x3e   :  { %570 = vmatpush1.msra.mxu0 %v413_v7  ;;  %490 = vmatprep.subr.mxu1 %v445_v29  ;;  %v677_v29 = vld [vmem:[#allocation2 + $0x2b0] sm:$0xff] }
  0x3f   :  { %571 = vmatprep.subr.mxu0 %v412_v9  ;;  %491 = vmatpush1.msra.mxu1 %v444_v31  ;;  %v676_v31 = vld [vmem:[#allocation2 + $0x2a8] sm:$0xff] }
  0x40   :  { %572 = vmatpush1.msra.mxu0 %v411_v11  ;;  %492 = vmatprep.subr.mxu1 %v443_v33  ;;  %v674_v33 = vld [vmem:[#allocation2 + $0x298] sm:$0xff] }
  0x41   :  { %573 = vmatprep.subr.mxu0 %v410_v14  ;;  %493 = vmatpush1.msra.mxu1 %v442_v35 }
  0x42   :  { %574 = vmatpush1.msra.mxu0 %v409_v16  ;;  %494 = vmatprep.subr.mxu1 %v441_v37  ;;  %v671_v37 = vld [vmem:[#allocation2 + $0x280] sm:$0xff] }
  0x43   :  { %575 = vmatprep.subr.mxu0 %v408_v18  ;;  %495 = vmatpush1.msra.mxu1 %v440_v39  ;;  %v669_v39 = vld [vmem:[#allocation2 + $0x270] sm:$0xff] }
  0x44   :  { %576 = vmatpush1.msra.mxu0 %v407_v20  ;;  %496 = vmatprep.subr.mxu1 %v439_v41  ;;  %v682_v20 = vld [vmem:[#allocation2 + $0x2d8] sm:$0xff]  ;;  %v667_v41 = vld [vmem:[#allocation2 + $0x260] sm:$0xff] }
  0x45   :  { %577 = vmatprep.subr.mxu0 %v406_v22  ;;  %497 = vmatpush1.msra.mxu1 %v438_v43  ;;  %v665_v43 = vld [vmem:[#allocation2 + $0x250] sm:$0xff] }
  0x46   :  { %578 = vmatpush1.msra.mxu0 %v405_v24  ;;  %621 = vmatprep.mubr.f32.mxu0 %v1029_v46 }
  0x47   :  { %579 = vmatprep.subr.mxu0 %v404_v26  ;;  %498 = vmatprep.subr.mxu1 %v437_v45  ;;  %v679_v26 = vld [vmem:[#allocation2 + $0x2c0] sm:$0xff] }
  0x48   :  { %580 = vmatpush1.msra.mxu0 %v403_v28  ;;  %499 = vmatpush1.msra.mxu1 %v436_v47  ;;  %v663_v45 = vld [vmem:[#allocation2 + $0x240] sm:$0xff]  ;;  %v662_v47 = vld [vmem:[#allocation2 + $0x238] sm:$0xff] }
  0x49   :  { %581 = vmatprep.subr.mxu0 %v402_v30  ;;  %532 = vmatprep.mubr.f32.mxu1 %v1029_v46 }
  0x4a   :  { %582 = vmatpush1.msra.mxu0 %v401_v32  ;;  %687 = vmatprep.subr.mxu1 %v686_v48  ;;  %v675_v32 = vld [vmem:[#allocation2 + $0x2a0] sm:$0xff]  ;;  %v661_v48 = vld [vmem:[#allocation2 + $0x230] sm:$0xff] }
  0x4b   :  { %583 = vmatprep.subr.mxu0 %v400_v34  ;;  %v673_v34 = vld [vmem:[#allocation2 + $0x290] sm:$0xff] }
  0x4c   :  { %584 = vmatpush1.msra.mxu0 %v399_v36  ;;  %v672_v36 = vld [vmem:[#allocation2 + $0x288] sm:$0xff] }
  0x4d   :  { %585 = vmatprep.subr.mxu0 %v398_v38  ;;  %v670_v38 = vld [vmem:[#allocation2 + $0x278] sm:$0xff] }
  0x4e   :  { %586 = vmatpush1.msra.mxu0 %v397_v40  ;;  %v668_v40 = vld [vmem:[#allocation2 + $0x268] sm:$0xff] }
  0x4f   :  { %587 = vmatprep.subr.mxu0 %v396_v42  ;;  %v666_v42 = vld [vmem:[#allocation2 + $0x258] sm:$0xff] }
  0x50   :  { %588 = vmatpush1.msra.mxu0 %v395_v44  ;;  %v664_v44 = vld [vmem:[#allocation2 + $0x248] sm:$0xff] }
  0xdf   :  { %v952_v49 = vpop.f32.mrf.mxu0 }
  0xe0   :  { %v974_v51 = vpop.f32.mrf.mxu1 }
  0xe1   :  { %v145_v50 = vpop.f32.mrf.mxu0  ;;  %v248_v55 = vadd.f32 %v974_v51, %v952_v49  ;;  %v660_v49 = vld [vmem:[#allocation2 + $0x228] sm:$0xff]  ;;  %v658_v51 = vld [vmem:[#allocation2 + $0x218] sm:$0xff] }
  0xe2   :  { %v242_v53 = vpop.f32.mrf.mxu1 }
  0xe3   :  { %v243_v59 = vadd.f32 %v242_v53, %v145_v50  ;;  %v659_v50 = vld [vmem:[#allocation2 + $0x220] sm:$0xff] }
  0xe4   :  { %v977_v56 = vpop.f32.mrf.mxu1 }
  0xe5   :  { %v955_v52 = vpop.f32.mrf.mxu0 }
  0xe6   :  { %v252_v62 = vpop.f32.mrf.mxu1  ;;  %v258_v1 = vadd.f32 %v977_v56, %v955_v52  ;;  %v657_v52 = vld [vmem:[#allocation2 + $0x210] sm:$0xff] }
  0xe7   :  { %v155_v54 = vpop.f32.mrf.mxu0 }
  0xe8   :  { %v253_v5 = vadd.f32 %v252_v62, %v155_v54  ;;  %v656_v54 = vld [vmem:[#allocation2 + $0x208] sm:$0xff] }
  0xf1   :  { %v996_v57 = vpop.f32.mrf.mxu0 }
  0xf2   :  { %v377_v60 = vadd.f32 %v996_v57, %v248_v55  ;;  %v655_v55 = vld [vmem:[#allocation2 + $0x200] sm:$0xff] }
  0xf3   :  { %v357_v61 = vpop.f32.mrf.mxu0 }
  0xf4   :  { %v388_v63 = vadd.f32 %v896_v58, %v377_v60  ;;  %v376_v0 = vadd.f32 %v357_v61, %v243_v59 }
  0xf5   :  { %v999_v2 = vpop.f32.mrf.mxu0 }
  0xf6   :  { %v1204_v3 = vmax.f32 %v388_v63, 0.0  ;;  %v387_v4 = vadd.f32 %v896_v58, %v376_v0  ;;  %v379_v6 = vadd.f32 %v999_v2, %v258_v1 }
  0xf7   :  { %v367_v7 = vpop.f32.mrf.mxu0 }
  0xf8   :  { %v1206_v8 = vmax.f32 %v387_v4, 0.0  ;;  %v378_v9 = vadd.f32 %v367_v7, %v253_v5  ;;  %v428_v10 = vrot.slane %v1204_v3, 1  ;;  %v390_v12 = vadd.f32 %v896_v58, %v379_v6 }
  0xf9   :  { %v647_v56 = vrot.slane %v1204_v3, 2 }
  0xfa   :  { %v427_v11 = vrot.slane %v1206_v8, 1  ;;  %622 = vmatmul.mubr.f32.vlgmr.msra.gmra.mxu0 %v1206_v8  ;;  %v389_v14 = vadd.f32 %v896_v58, %v378_v9  ;;  %v1217_v21 = vmax.f32 %v390_v12, 0.0  ;;  %v646_v53 = vrot.slane %v1206_v8, 2 }
  0xfb   :  { %627 = vmatprep.mubr.f32.mxu0 %v1029_v46 }
  0xfc   :  { %v433_v16 = vsel %vm52_vm0, %v427_v11, %v428_v10  ;;  %v1214_v18 = vmax.f32 %v389_v14, 0.0  ;;  %v430_v28 = vrot.slane %v1217_v21, 1  ;;  %v652_v57 = vsel %vm265_vm2, %v646_v53, %v647_v56 }
  0xfd   :  { %533 = vmatmul.mubr.f32.vlgmr.msra.gmra.mxu1 %v433_v16  ;;  %v649_v60 = vrot.slane %v1217_v21, 2  ;;  %v792_v16 = vsub.s32 1, %v1103_v13 }
  0xfe   :  { %688 = vmatpush1.msra.mxu1 %v685_v15  ;;  %628 = vmatmul.mubr.f32.gmra.mxu0 %v1204_v3  ;;  %v429_v22 = vrot.slane %v1214_v18, 1  ;;  %v434_v35 = vsel %vm52_vm0, %v430_v28, %v427_v11  ;;  %v648_v58 = vrot.slane %v1214_v18, 2  ;;  %v788_v11 = vsub.s32 0, %v1103_v13 }
  0xff   :  { %689 = vmatprep.subr.mxu1 %v684_v17  ;;  %538 = vmatprep.mubr.f32.mxu1 %v1029_v46  ;;  %v653_v62 = vsel %vm265_vm2, %v649_v60, %v646_v53 }
 0x100   :  { %690 = vmatpush1.msra.mxu1 %v683_v19  ;;  %633 = vmatprep.mubr.f32.mxu0 %v1029_v46  ;;  %v432_v24 = vsel %vm52_vm0, %v428_v10, %v429_v22  ;;  %v431_v30 = vsel %vm52_vm0, %v429_v22, %v430_v28  ;;  %v651_v59 = vsel %vm265_vm2, %v647_v56, %v648_v58 }
 0x101   :  { %691 = vmatprep.subr.mxu1 %v682_v20  ;;  %539 = vmatmul.mubr.f32.gmra.mxu1 %v432_v24  ;;  %v650_v61 = vsel %vm265_vm2, %v648_v58, %v649_v60 }
 0x102   :  { %634 = vmatmul.mubr.f32.gmra.mxu0 %v1214_v18  ;;  %692 = vmatpush1.msra.mxu1 %v681_v23 }
 0x103   :  { %544 = vmatprep.mubr.f32.mxu1 %v1029_v46  ;;  %693 = vmatprep.subr.mxu1 %v680_v25 }
 0x104   :  { %639 = vmatprep.mubr.f32.mxu0 %v1029_v46  ;;  %694 = vmatpush1.msra.mxu1 %v679_v26 }
 0x105   :  { %695 = vmatprep.subr.mxu1 %v678_v27  ;;  %545 = vmatmul.mubr.f32.gmra.mxu1 %v431_v30 }
 0x106   :  { %696 = vmatpush1.msra.mxu1 %v677_v29  ;;  %640 = vmatmul.mubr.f32.gmra.mxu0 %v1217_v21 }
 0x107   :  { %697 = vmatprep.subr.mxu1 %v676_v31  ;;  %550 = vmatprep.mubr.f32.mxu1 %v1029_v46 }
 0x108   :  { %698 = vmatpush1.msra.mxu1 %v675_v32 }
 0x109   :  { %699 = vmatprep.subr.mxu1 %v674_v33  ;;  %551 = vmatmul.mubr.f32.gmra.mxu1 %v434_v35 }
 0x10a   :  { %700 = vmatpush1.msra.mxu1 %v673_v34  ;;  %751 = vmatprep.mubr.f32.mxu1 %v1029_v46 }
 0x10b   :  { %701 = vmatprep.subr.mxu1 %v672_v36 }
 0x10c   :  { %702 = vmatpush1.msra.mxu1 %v671_v37 }
 0x10d   :  { %703 = vmatprep.subr.mxu1 %v670_v38 }
 0x10e   :  { %704 = vmatpush1.msra.mxu1 %v669_v39 }
 0x10f   :  { %705 = vmatprep.subr.mxu1 %v668_v40 }
 0x110   :  { %706 = vmatpush1.msra.mxu1 %v667_v41 }
 0x111   :  { %707 = vmatprep.subr.mxu1 %v666_v42 }
 0x112   :  { %708 = vmatpush1.msra.mxu1 %v665_v43 }
 0x113   :  { %709 = vmatprep.subr.mxu1 %v664_v44 }
 0x114   :  { %710 = vmatpush1.msra.mxu1 %v663_v45 }
 0x115   :  { %711 = vmatprep.subr.mxu1 %v662_v47 }
 0x116   :  { %712 = vmatpush1.msra.mxu1 %v661_v48 }
 0x117   :  { %713 = vmatprep.subr.mxu1 %v660_v49 }
 0x118   :  { %714 = vmatpush1.msra.mxu1 %v659_v50 }
 0x119   :  { %715 = vmatprep.subr.mxu1 %v658_v51 }
 0x11a   :  { %716 = vmatpush1.msra.mxu1 %v657_v52 }
 0x11b   :  { %717 = vmatprep.subr.mxu1 %v656_v54 }
 0x11c   :  { %718 = vmatpush1.msra.mxu1 %v655_v55 }
 0x11d   :  { %752 = vmatmul.mubr.f32.vlgmr.msra.gmra.mxu1 %v652_v57 }
 0x11e   :  { %757 = vmatprep.mubr.f32.mxu1 %v1029_v46 }
 0x121   :  { %758 = vmatmul.mubr.f32.gmra.mxu1 %v651_v59 }
 0x122   :  { %763 = vmatprep.mubr.f32.mxu1 %v1029_v46 }
 0x125   :  { %764 = vmatmul.mubr.f32.gmra.mxu1 %v650_v61 }
 0x126   :  { %769 = vmatprep.mubr.f32.mxu1 %v1029_v46  ;;  %v784_v46 = vld [vmem:[%s1268_s4] sm:$0x3] }
 0x127   :  { %v789_v19 = vrot.slane %v784_v46, %v788_v11  ;;  %v793_v24 = vrot.slane %v784_v46, %v792_v16 }
 0x129   :  { %770 = vmatmul.mubr.f32.gmra.mxu1 %v653_v62 }
 0x1ba   :  { %v623_v3 = vpop.f32.mrf.mxu0 }
 0x1bc   :  { %v625_v5 = vpop.f32.mrf.mxu0 }
 0x1bd   :  { %v534_v63 = vpop.f32.mrf.mxu1 }
 0x1be   :  { %v629_v7 = vpop.f32.mrf.mxu0  ;;  %v624_v12 = vadd.f32 %v623_v3, %v534_v63 }
 0x1bf   :  { %v536_v0 = vpop.f32.mrf.mxu1 }
 0x1c0   :  { %v631_v9 = vpop.f32.mrf.mxu0  ;;  %v626_v17 = vadd.f32 %v625_v5, %v536_v0 }
 0x1c1   :  { %v540_v1 = vpop.f32.mrf.mxu1 }
 0x1c2   :  { %v635_v14 = vpop.f32.mrf.mxu0  ;;  %v630_v21 = vadd.f32 %v629_v7, %v540_v1 }
 0x1c3   :  { %v542_v2 = vpop.f32.mrf.mxu1 }
 0x1c4   :  { %v637_v22 = vpop.f32.mrf.mxu0  ;;  %v632_v26 = vadd.f32 %v631_v9, %v542_v2 }
 0x1c5   :  { %v546_v4 = vpop.f32.mrf.mxu1 }
 0x1c6   :  { %v636_v32 = vadd.f32 %v635_v14, %v546_v4  ;;  %v641_v33 = vpop.f32.mrf.mxu0 }
 0x1c7   :  { %v548_v6 = vpop.f32.mrf.mxu1 }
 0x1c8   :  { %v638_v38 = vadd.f32 %v637_v22, %v548_v6  ;;  %v643_v45 = vpop.f32.mrf.mxu0 }
 0x1c9   :  { %v552_v8 = vpop.f32.mrf.mxu1 }
 0x1ca   :  { %v642_v42 = vadd.f32 %v641_v33, %v552_v8 }
 0x1cb   :  { %v554_v10 = vpop.f32.mrf.mxu1 }
 0x1cc   :  { %v644_v51 = vadd.f32 %v643_v45, %v554_v10 }
 0x1dd   :  { %v753_v15 = vpop.f32.mrf.mxu1 }
 0x1de   :  { %v776_v18 = vadd.f32 %v753_v15, %v624_v12 }
 0x1df   :  { %v755_v20 = vpop.f32.mrf.mxu1 }
 0x1e0   :  { %v777_v23 = vadd.f32 %v755_v20, %v626_v17  ;;  %v796_v28 = vadd.f32 %v789_v19, %v776_v18 }
 0x1e1   :  { %v759_v25 = vpop.f32.mrf.mxu1 }
 0x1e2   :  { %v778_v27 = vadd.f32 %v759_v25, %v630_v21  ;;  %v797_v34 = vadd.f32 %v793_v24, %v777_v23  ;;  %v804_v39 = vmax.f32 %v796_v28, 0.0 }
 0x1e3   :  { %v761_v29 = vpop.f32.mrf.mxu1 }
 0x1e4   :  { %v798_v30 = vadd.f32 %v789_v19, %v778_v27  ;;  %v779_v31 = vadd.f32 %v761_v29, %v632_v26  ;;  %v805_v47 = vmax.f32 %v797_v34, 0.0 }
 0x1e5   :  { %v765_v35 = vpop.f32.mrf.mxu1 }
 0x1e6   :  { %v806_v36 = vmax.f32 %v798_v30, 0.0  ;;  %v799_v37 = vadd.f32 %v793_v24, %v779_v31  ;;  %v780_v40 = vadd.f32 %v765_v35, %v636_v32 }
 0x1e7   :  { %v767_v41 = vpop.f32.mrf.mxu1 }
 0x1e8   :  { %v813_v43 = vsel %vm812_vm3, %v806_v36, -inf  ;;  %v807_v44 = vmax.f32 %v799_v37, 0.0  ;;  %v781_v49 = vadd.f32 %v767_v41, %v638_v38  ;;  %v800_v56 = vadd.f32 %v789_v19, %v780_v40 }
 0x1e9   :  { %v814_v48 = vmax.f32 %v804_v39, %v813_v43  ;;  %v771_v50 = vpop.f32.mrf.mxu1 }
 0x1ea   :  { %v821_v52 = vsel %vm812_vm3, %v807_v44, -inf  ;;  %v782_v53 = vadd.f32 %v771_v50, %v642_v42  ;;  %v801_v62 = vadd.f32 %v793_v24, %v781_v49  ;;  %v808_v2 = vmax.f32 %v800_v56, 0.0 }
 0x1eb   :  { %v815_v54 = vrot.slane %v814_v48, 4  ;;  %v822_v55 = vmax.f32 %v805_v47, %v821_v52  ;;  %v773_v57 = vpop.f32.mrf.mxu1 }
 0x1ec   :  { %v802_v58 = vadd.f32 %v789_v19, %v782_v53  ;;  %v783_v59 = vadd.f32 %v773_v57, %v644_v51  ;;  %v809_v7 = vmax.f32 %v801_v62, 0.0 }
 0x1ed   :  { %v816_v60 = vmax.f32 %v814_v48, %v815_v54  ;;  %v823_v61 = vrot.slane %v822_v55, 4 }
 0x1ee   :  { %v810_v63 = vmax.f32 %v802_v58, 0.0  ;;  %v803_v0 = vadd.f32 %v793_v24, %v783_v59 }
 0x1ef   :  { %v824_v1 = vmax.f32 %v822_v55, %v823_v61  ;;  %v817_v3 = vrot.slane %v816_v60, 2 }
 0x1f0   :  { %v832_v4 = vsel %vm812_vm3, %v810_v63, -inf  ;;  %v811_v5 = vmax.f32 %v803_v0, 0.0 }
 0x1f1   :  { %v825_v6 = vrot.slane %v824_v1, 2  ;;  %v833_v8 = vmax.f32 %v808_v2, %v832_v4  ;;  %v818_v46 = vmax.f32 %v816_v60, %v817_v3 }
 0x1f2   :  { %v840_v9 = vsel %vm812_vm3, %v811_v5, -inf }
 0x1f3   :  { %v834_v10 = vrot.slane %v833_v8, 4  ;;  %v841_v11 = vmax.f32 %v809_v7, %v840_v9  ;;  %v826_v12 = vmax.f32 %v824_v1, %v825_v6  ;;  %v819_v18 = vrot.slane %v818_v46, 1 }
 0x1f5   :  { %v835_v14 = vmax.f32 %v833_v8, %v834_v10  ;;  %v842_v15 = vrot.slane %v841_v11, 4  ;;  %v827_v19 = vrot.slane %v826_v12, 1  ;;  %v820_v24 = vmax.f32 %v818_v46, %v819_v18 }
 0x1f7   :  { %v836_v16 = vrot.slane %v835_v14, 2  ;;  %v843_v17 = vmax.f32 %v841_v11, %v842_v15  ;;  %v828_v25 = vmax.f32 %v826_v12, %v827_v19  ;;  %v830_v29 = vsel %vm829_vm4, %v820_v24, 0.0 }
 0x1f9   :  { %v837_v20 = vmax.f32 %v835_v14, %v836_v16  ;;  %v844_v21 = vrot.slane %v843_v17, 2  ;;  %v831_v30 = vsel %vm829_vm4, %v828_v25, 0.0 }
 0x1fb   :  { %v838_v22 = vrot.slane %v837_v20, 1  ;;  %v845_v23 = vmax.f32 %v843_v17, %v844_v21 }
 0x1fd   :  { %v839_v26 = vmax.f32 %v837_v20, %v838_v22  ;;  %v846_v27 = vrot.slane %v845_v23, 1 }
 0x1ff   :  { %v847_v28 = vmax.f32 %v845_v23, %v846_v27  ;;  %v849_v31 = vsel %vm848_vm5, %v839_v26, %v830_v29 }
 0x201   :  { %v850_v32 = vsel %vm848_vm5, %v847_v28, %v831_v30 }
 0x202   :  { %v853_v33 = vcombine.low %v849_v31, %v850_v32 }
 0x204   :  { %897 = vst.sshfl [vmem:[%s1269_s5] sm:$0x33 pattern:$0x76325410] %v853_v33 }
 0x205   :  { %867 = vsyncpa [#allocation3], 1 }

</bundles_post_ra>
